<compile_context>
chip_gen: v7x
topology: tpu7x:2x2x1
jax: 0.10.0
libtpu: 0.0.40
codegen_flags: <defaults>
</compile_context>

<pallas_src>
import numpy as np
import jax
import jax.numpy as jnp
from jax.experimental import pallas as pl
from jax.experimental.pallas import tpu as pltpu

CIDER_WEIGHT = 1.0
DIVERSE_WEIGHT = 0.3


def _cdiv(a, b):
    return -(-a // b)


def _round_up(x, m):
    return _cdiv(x, m) * m


def _largest_divisor_leq(n, bound):
    bound = max(1, min(n, bound))
    for d in range(bound, 0, -1):
        if n % d == 0:
            return d
    return 1


# ----------------------------- Pallas kernel -------------------------------
def _reward_loss_kernel(lens_ref, logp_ref, div_ref, s_ref, t_ref):
    # grid = (batch tiles ["parallel"], seq tiles ["arbitrary" reduction axis])
    j = pl.program_id(1)
    tile_b, tile_l = logp_ref.shape

    @pl.when(j == 0)
    def _init():
        s_ref[...] = jnp.zeros_like(s_ref)
        t_ref[...] = jnp.zeros_like(t_ref)

    # Rebuild the prefix mask in-kernel from per-row lengths (no [B,L] mask
    # stream from HBM — this kernel is bandwidth bound).
    row_len = lens_ref[...]                                          # (tile_b, 1) int32
    col = jax.lax.broadcasted_iota(jnp.int32, (tile_b, tile_l), 1) + j * tile_l
    valid = col < row_len                                            # (tile_b, tile_l)

    lp = logp_ref[...].astype(jnp.float32)
    dv = div_ref[...].astype(jnp.float32)
    # where(), not multiply-by-mask: undefined values in ragged-tail / padded
    # regions must not propagate (NaN * 0 == NaN).
    s_c = jnp.where(valid, lp, 0.0)                                  # logp * mask
    t_c = jnp.where(valid, lp * dv, 0.0)                             # logp * diverse * mask

    # Lane-resident per-row partial sums: add the 128-lane chunks of this tile
    # into the resident (tile_b, 128) output blocks. Pure VALU vreg adds; the
    # single cross-lane reduce is deferred to the JAX epilogue.
    s_acc = s_ref[...]
    t_acc = t_ref[...]
    for c in range(tile_l // 128):
        sl = slice(c * 128, (c + 1) * 128)
        s_acc = s_acc + s_c[:, sl]
        t_acc = t_acc + t_c[:, sl]
    s_ref[...] = s_acc
    t_ref[...] = t_acc


def _choose_tiles(B, L, stream_itemsize):
    """Pick (tile_b, tile_l) multiples of (8, 128) that divide the aligned
    shape, give >=2 batch tiles / >=4 seq tiles when possible, and keep the
    per-step streamed bytes around <=2 MiB (>=85% HBM roofline)."""
    b8 = _round_up(max(B, 1), 8)
    l128 = _round_up(max(L, 1), 128)
    h = b8 // 8       # sublane groups
    g = l128 // 128   # lane chunks

    # batch tile: >=2 tiles once B allows (v7x megacore), modest row strips.
    cap_groups = 1 if h < 2 else min(max(1, h // 2), 32)
    tile_b = 8 * _largest_divisor_leq(h, cap_groups)

    # seq tile: ~<=2 MiB streamed per step and >=4 seq tiles when L is long.
    cap_budget = max(1, (2 << 20) // (tile_b * 128 * stream_itemsize))
    cap_pipe = max(1, g // 4) if g >= 4 else g
    tile_l = 128 * _largest_divisor_leq(g, min(cap_budget, cap_pipe))
    return tile_b, tile_l, b8, l128


def reward_loss_pallas(logp, lengths, cider_sample, cider_greedy,
                       diverse_sample, diverse_greedy):
    """Forward loss of RewardLoss.

    loss = -sum(logp * rewards * mask) / sum(mask), with
      rewards[b,l] = 1.0*(cider_s[b]-cider_g[b]) + 0.3*(div_s[b,l]-div_g[b])
      mask[b,l]    = l < lengths[b]   (== the module's sample_word_masks)

    logp / diverse_sample may be bf16 or f32; they are streamed in their input
    dtype and accumulated in f32 in-kernel.
    """
    B, L = logp.shape
    assert diverse_sample.shape == (B, L)
    lengths = jnp.clip(jnp.asarray(lengths, jnp.int32).reshape(B), 0, L)

    it_lp = jnp.dtype(logp.dtype).itemsize
    it_dv = jnp.dtype(diverse_sample.dtype).itemsize
    tile_b, tile_l, b8, l128 = _choose_tiles(B, L, it_lp + it_dv)
    nb, nl = b8 // tile_b, l128 // tile_l

    # Pad the big [B,L] streams only when they are not already (8,128)-aligned
    # (a pad is a full HBM read+write); pad values are masked in-kernel anyway.
    if (b8, l128) != (B, L):
        pad2 = lambda x: jnp.pad(x, ((0, b8 - B), (0, l128 - L)))
        logp_p, div_p = pad2(logp), pad2(diverse_sample)
    else:
        logp_p, div_p = logp, diverse_sample
    lens_p = jnp.pad(lengths, (0, b8 - B)).reshape(b8, 1)        # tiny O(B) pad

    spec_bl = pl.BlockSpec((tile_b, tile_l), lambda i, j: (i, j))
    spec_len = pl.BlockSpec((tile_b, 1), lambda i, j: (i, 0))
    out_spec = pl.BlockSpec((tile_b, 128), lambda i, j: (i, 0))

    # VMEM budget derived from actual usage (double-buffered streams + resident
    # outputs + f32 compute temporaries), capped for v7x's 64 MiB VMEM/TC.
    block_bytes = tile_b * tile_l * (it_lp + it_dv)
    vmem_need = (2 * block_bytes                  # double-buffered input streams
                 + 2 * tile_b * 4                 # lengths blocks
                 + 2 * 2 * tile_b * 128 * 4       # two resident output blocks
                 + 6 * tile_b * tile_l * 4)       # f32 temporaries headroom
    vmem_limit = int(min(48 << 20,
                         max(16 << 20, _round_up(vmem_need + (2 << 20), 1 << 20))))

    flops = 6 * b8 * l128
    bytes_accessed = B * L * (it_lp + it_dv) + b8 * 4 + 2 * b8 * 128 * 4

    s_out, t_out = pl.pallas_call(
        _reward_loss_kernel,
        out_shape=(jax.ShapeDtypeStruct((b8, 128), jnp.float32),
                   jax.ShapeDtypeStruct((b8, 128), jnp.float32)),
        grid=(nb, nl),
        in_specs=[spec_len, spec_bl, spec_bl],
        out_specs=(out_spec, out_spec),
        compiler_params=pltpu.CompilerParams(
            dimension_semantics=("parallel", "arbitrary"),
            vmem_limit_bytes=vmem_limit),
        cost_estimate=pl.CostEstimate(flops=flops, transcendentals=0,
                                      bytes_accessed=bytes_accessed),
    )(lens_p, logp_p, div_p)

    # Tiny JAX epilogue: final 128-lane reduce, per-row reward bias, division.
    s_rows = jnp.sum(s_out, axis=-1)[:B]          # S_b = sum_l logp*mask
    t_rows = jnp.sum(t_out, axis=-1)[:B]          # T_b = sum_l logp*div_s*mask
    bias = (CIDER_WEIGHT * (cider_sample - cider_greedy)
            - DIVERSE_WEIGHT * diverse_greedy).astype(jnp.float32).reshape(B)
    num = jnp.sum(bias * s_rows) + DIVERSE_WEIGHT * jnp.sum(t_rows)
    den = jnp.sum(lengths).astype(jnp.float32)    # == sum(sample_word_masks)
    # No empty-mask guard: matches the PyTorch module (divides by zero if the
    # whole batch is masked).
    return -num / den


# -------------------- host-side reward glue (string ops) -------------------
def token_ngram_freq(sents, len_size, document_freq):
    """Faithful port of RewardLoss.token_ngram_freq (pure Python / numpy)."""
    freqs = np.zeros(shape=[len(sents), len_size])
    for sid in sents:
        words = sents[sid][0].split()[:-1]
        tmp, count = np.zeros(len_size), np.zeros(len_size)
        for j in range(len(words) - 4):
            if '.' in words[j:j + 4] or ',' in words[j:j + 4]:
                continue
            ngram = ' '.join(words[j:j + 4])
            if ngram in document_freq:
                tmp[j:j + 4] += 1.0 / document_freq[ngram]
                count[j:j + 4] += 1
        count[count == 0] = 1
        freqs[int(sid)] = tmp / count
    return freqs


def global_ngram_freq(sents, document_freq):
    """Faithful port of RewardLoss.global_ngram_freq (pure Python / numpy)."""
    freqs = []
    for sid in sents:
        words = sents[sid][0].split()[:-1]
        tmp, count = 0, 0
        for j in range(len(words) - 4):
            if '.' in words[j:j + 4] or ',' in words[j:j + 4]:
                continue
            ngram = ' '.join(words[j:j + 4])
            if ngram in document_freq:
                tmp += 1.0 / document_freq[ngram]
                count += 1
        freqs.append(tmp / max(count, 1))
    return np.expand_dims(np.array(freqs), 1)


# ---------------------------------- main -----------------------------------
if __name__ == "__main__":
    B, L = 2, 8

    key = jax.random.PRNGKey(0)
    k_logp, k_cs, k_cg = jax.random.split(key, 3)

    # sample_word_logprobs: [B, L] log-probabilities (negative values)
    logp = -jax.nn.softplus(jax.random.normal(k_logp, (B, L), dtype=jnp.float32))

    # per-row valid-token counts; the module's sample_word_masks is the prefix
    # mask built from these (mask used only by the plain-JAX reference below).
    lengths = jnp.array([L, L - 2], dtype=jnp.int32)
    mask = (jnp.arange(L)[None, :] < lengths[:, None]).astype(jnp.float32)

    # Synthetic captions + document-frequency table (deterministic, in-script)
    words = "a b c d e f g a b c".split()
    sample_sents = {'0': [' '.join(words[:L + 1]) + ' <eos>'],
                    '1': [' '.join(words[1:L]) + ' <eos>']}
    greedy_sents = {'0': ['a b c d e f g h <eos>'],
                    '1': ['b c d e f g a <eos>']}
    document_freq = {'a b c d': 4.0, 'b c d e': 2.0, 'c d e f': 5.0,
                     'd e f g': 3.0, 'e f g a': 6.0}

    # diverse-reward terms (host string processing, no Pallas equivalent);
    # the big [B,L] stream is uploaded as bf16 to halve HBM traffic.
    diverse_sample = jnp.asarray(
        token_ngram_freq(sample_sents, L, document_freq), dtype=jnp.bfloat16)  # [B, L]
    diverse_greedy = jnp.asarray(
        global_ngram_freq(greedy_sents, document_freq), dtype=jnp.float32)     # [B, 1]

    # TODO(synk): CIDEr scorer is an external corpus-statistics string metric with no
    # Pallas equivalent; stand in with deterministic synthetic per-sentence scores.
    cider_sample = jax.random.uniform(k_cs, (B, 1), dtype=jnp.float32)         # [B, 1]
    cider_greedy = jax.random.uniform(k_cg, (B, 1), dtype=jnp.float32)         # [B, 1]

    loss = reward_loss_pallas(logp, lengths, cider_sample, cider_greedy,
                              diverse_sample, diverse_greedy)
    loss = jax.block_until_ready(loss)

    # Plain-JAX reference of the forward-pass tensor math (same bf16 inputs).
    div_s32 = diverse_sample.astype(jnp.float32)
    rewards_ref = (CIDER_WEIGHT * (cider_sample - cider_greedy)
                   + DIVERSE_WEIGHT * (div_s32 - diverse_greedy))
    loss_ref = -jnp.sum(logp * rewards_ref * mask) / jnp.sum(mask)
    np.testing.assert_allclose(np.asarray(loss), np.asarray(loss_ref),
                               rtol=1e-5, atol=1e-6)

    print("KERNEL_OK")
</pallas_src>

<mosaic_0001>
module attributes {stable_mosaic.version = 11 : i64} {
  func.func @_reward_loss_kernel(%arg0: i32, %arg1: i32, %arg2: memref<8x1xi32, #tpu.memory_space<vmem>>, %arg3: memref<8x128xf32, #tpu.memory_space<vmem>>, %arg4: memref<8x128xbf16, #tpu.memory_space<vmem>>, %arg5: memref<8x128xf32, #tpu.memory_space<vmem>>, %arg6: memref<8x128xf32, #tpu.memory_space<vmem>>) attributes {dimension_semantics = [#tpu.dimension_semantics<parallel>, #tpu.dimension_semantics<arbitrary>], iteration_bounds = array<i64: 1, 1>, scalar_prefetch = 0 : i64, scratch_operands = 0 : i64, tpu.core_type = #tpu.core_type<tc>, window_params = [{transform_indices = @transform_0, window_bounds = array<i64: 8, 1>}, {transform_indices = @transform_1, window_bounds = array<i64: 8, 128>}, {transform_indices = @transform_2, window_bounds = array<i64: 8, 128>}, {transform_indices = @transform_3, window_bounds = array<i64: 8, 128>}, {transform_indices = @transform_4, window_bounds = array<i64: 8, 128>}]} {
    %c0_i32 = arith.constant 0 : i32
    %0 = arith.cmpi eq, %arg1, %c0_i32 : i32
    %1 = arith.extui %0 : i1 to i32
    %c0_i32_0 = arith.constant 0 : i32
    %2 = arith.cmpi ne, %1, %c0_i32_0 : i32
    scf.if %2 {
      %cst_15 = arith.constant 0.000000e+00 : f32
      %24 = vector.broadcast %cst_15 : f32 to vector<8x128xf32>
      %c0_16 = arith.constant 0 : index
      %c0_17 = arith.constant 0 : index
      %25 = vector.load %arg5[%c0_16, %c0_17] : memref<8x128xf32, #tpu.memory_space<vmem>>, vector<8x128xf32>
      tpu.vector_store %arg5[%c0_16, %c0_17], %24 {strides = array<i32>} : memref<8x128xf32, #tpu.memory_space<vmem>>, vector<8x128xf32>,
      %cst_18 = arith.constant 0.000000e+00 : f32
      %26 = vector.broadcast %cst_18 : f32 to vector<8x128xf32>
      %c0_19 = arith.constant 0 : index
      %c0_20 = arith.constant 0 : index
      %27 = vector.load %arg6[%c0_19, %c0_20] : memref<8x128xf32, #tpu.memory_space<vmem>>, vector<8x128xf32>
      tpu.vector_store %arg6[%c0_19, %c0_20], %26 {strides = array<i32>} : memref<8x128xf32, #tpu.memory_space<vmem>>, vector<8x128xf32>,
    } else {
    }
    %c0 = arith.constant 0 : index
    %c0_1 = arith.constant 0 : index
    %3 = vector.load %arg2[%c0, %c0_1] : memref<8x1xi32, #tpu.memory_space<vmem>>, vector<8x1xi32>
    %4 = tpu.iota {dimensions = array<i32: 1>} : vector<8x128xi32>
    %c128_i32 = arith.constant 128 : i32
    %5 = arith.muli %arg1, %c128_i32 : i32
    %6 = vector.broadcast %5 : i32 to vector<8x128xi32>
    %7 = arith.addi %4, %6 : vector<8x128xi32>
    %8 = vector.broadcast %3 : vector<8x1xi32> to vector<8x128xi32>
    %9 = arith.cmpi slt, %7, %8 : vector<8x128xi32>
    %c0_2 = arith.constant 0 : index
    %c0_3 = arith.constant 0 : index
    %10 = vector.load %arg3[%c0_2, %c0_3] : memref<8x128xf32, #tpu.memory_space<vmem>>, vector<8x128xf32>
    %c0_4 = arith.constant 0 : index
    %c0_5 = arith.constant 0 : index
    %11 = vector.load %arg4[%c0_4, %c0_5] : memref<8x128xbf16, #tpu.memory_space<vmem>>, vector<8x128xbf16>
    %12 = arith.extf %11 : vector<8x128xbf16> to vector<8x128xf32>
    %cst = arith.constant 0.000000e+00 : f32
    %13 = vector.broadcast %cst : f32 to vector<8x128xf32>
    %14 = arith.select %9, %10, %13 : vector<8x128xi1>, vector<8x128xf32>
    %15 = arith.mulf %10, %12 : vector<8x128xf32>
    %cst_6 = arith.constant 0.000000e+00 : f32
    %16 = vector.broadcast %cst_6 : f32 to vector<8x128xf32>
    %17 = arith.select %9, %15, %16 : vector<8x128xi1>, vector<8x128xf32>
    %c0_7 = arith.constant 0 : index
    %c0_8 = arith.constant 0 : index
    %18 = vector.load %arg5[%c0_7, %c0_8] : memref<8x128xf32, #tpu.memory_space<vmem>>, vector<8x128xf32>
    %c0_9 = arith.constant 0 : index
    %c0_10 = arith.constant 0 : index
    %19 = vector.load %arg6[%c0_9, %c0_10] : memref<8x128xf32, #tpu.memory_space<vmem>>, vector<8x128xf32>
    %20 = arith.addf %18, %14 : vector<8x128xf32>
    %21 = arith.addf %19, %17 : vector<8x128xf32>
    %c0_11 = arith.constant 0 : index
    %c0_12 = arith.constant 0 : index
    %22 = vector.load %arg5[%c0_11, %c0_12] : memref<8x128xf32, #tpu.memory_space<vmem>>, vector<8x128xf32>
    tpu.vector_store %arg5[%c0_11, %c0_12], %20 {strides = array<i32>} : memref<8x128xf32, #tpu.memory_space<vmem>>, vector<8x128xf32>,
    %c0_13 = arith.constant 0 : index
    %c0_14 = arith.constant 0 : index
    %23 = vector.load %arg6[%c0_13, %c0_14] : memref<8x128xf32, #tpu.memory_space<vmem>>, vector<8x128xf32>
    tpu.vector_store %arg6[%c0_13, %c0_14], %21 {strides = array<i32>} : memref<8x128xf32, #tpu.memory_space<vmem>>, vector<8x128xf32>,
    return
  }
  func.func @transform_0(%arg0: i32, %arg1: i32) -> (i32, i32) {
    %c0_i32 = arith.constant 0 : i32
    %c0_i32_0 = arith.constant 0 : i32
    return %arg0, %c0_i32 : i32, i32
  }
  func.func @transform_1(%arg0: i32, %arg1: i32) -> (i32, i32) {
    %c0_i32 = arith.constant 0 : i32
    return %arg0, %arg1 : i32, i32
  }
  func.func @transform_2(%arg0: i32, %arg1: i32) -> (i32, i32) {
    %c0_i32 = arith.constant 0 : i32
    return %arg0, %arg1 : i32, i32
  }
  func.func @transform_3(%arg0: i32, %arg1: i32) -> (i32, i32) {
    %c0_i32 = arith.constant 0 : i32
    %c0_i32_0 = arith.constant 0 : i32
    return %arg0, %c0_i32 : i32, i32
  }
  func.func @transform_4(%arg0: i32, %arg1: i32) -> (i32, i32) {
    %c0_i32 = arith.constant 0 : i32
    %c0_i32_0 = arith.constant 0 : i32
    return %arg0, %c0_i32 : i32, i32
  }
}

</mosaic_0001>

<bundles_post_ra>
// kernel: tpu_custom_call.1
= control target key start
LH: loop header
LB: loop body
LE: loop exit
PB: predicated region body
PF: predicated region fallthrough
CT: control target
= control target key end

     0   :  { %10 = vsyncpa [#allocation3], 0  ;;  %v127_v1 = vmov 0   ;;  %s188_s0 = inlined_call_operand.vmem [shape: s32[8,1], index: 0, kind: input, shape index: {}]   ;;  %s189_s1 = inlined_call_operand.vmem [shape: f32[8,128], index: 1, kind: input, shape index: {}]   ;;  %s190_s2 = inlined_call_operand.vmem [shape: bf16[8,128], index: 2, kind: input, shape index: {}]   ;;  %s191_s3 = inlined_call_operand.hbm [shape: f32[8,128], index: 3, kind: output, shape index: {0}]   ;;  %s192_s4 = inlined_call_operand.hbm [shape: f32[8,128], index: 4, kind: output, shape index: {1}]  }
   0x1   :  { %v24_v0 = vld [vmem:[%s188_s0] sm:$0xff]  ;;  %78 = vset.pattern.permute.xlu0 %v127_v1 }
   0x2   :  { %11 = vsyncpa [#allocation5], 0  ;;  %31 = vperm.xlu0 %78, %v24_v0   ;;  %v35_v2 = vld [vmem:[%s190_s2] sm:$0xf]  ;;  %v25_v3 = vlaneseq  ;;  %s128_s21 = smov [#allocation2]   ;;  %s129_s0 = smov [#allocation4]  }
   0x3   :  { %v36_v4 = vunpack.c.l.bf16 %v35_v2  ;;  %v34_v5 = vld [vmem:[%s189_s1] sm:$0xff]  ;;  %s52_s22 = sshll.u32 %s128_s21, 4  ;;  %s62_s23 = sshll.u32 %s129_s0, 4  ;;  %s53_s22 = int_to_ptr.vmem [resolvable:$true] %s52_s22  ;;  %s63_s23 = int_to_ptr.vmem [resolvable:$true] %s62_s23 }
   0x4   :  { %v26_v6 = vand.u32 127, %v25_v3  ;;  %s79_s2 = scalar_lea.vmem %s53_s22, 128  ;;  %p84_p1 = scmp.lt.s32.totalorder %s53_s22, %s53_s22 }
   0x5   :  { %v38_v7 = vmul.f32 %v36_v4, %v34_v5  ;;  %p80_p0 = scmp.ne.s32.totalorder %s53_s22, %s79_s2  ;;  %p85_p2 = scmp.lt.s32.totalorder %s79_s2, %s79_s2 }
   0x7   :  { %p86_p3 = por %p85_p2, %p84_p1 }
   0x9   :  { %p87_p4 = pnand %p86_p3, %p80_p0 }
  0x81   :  { %v32_v8 = vpop.permute.xlu0 %31 }
  0x82   :  { %vm33_vm0 = vcmp.lt.s32.totalorder %v26_v6, %v32_v8 }
  0x83   :  { %v37_v9 = vsel %vm33_vm0, %v34_v5, 0.0  ;;  %v39_v10 = vsel %vm33_vm0, %v38_v7, 0.0 }
  0x84   :  { %44 = vst [vmem:[#allocation2] sm:$0xff] %v37_v9  ;;  %45 = vst [vmem:[#allocation4] sm:$0xff] %v39_v10 }
  0x85   :  { %90 = shalt.err (!%p87_p4)
}
  0x86   :  { %s91_s25 = scalar_lea.hbm %s191_s3, 128 }
  0x87   :  { %p92_p5 = scmp.ne.s32.totalorder %s191_s3, %s91_s25  ;;  %p95_p6 = scmp.lt.u32.totalorder %s91_s25, %s191_s3 }
  0x89   :  { %p97_p7 = pnand %p95_p6, %p92_p5 }
  0x8b   :  { %100 = shalt.err (!%p97_p7)
}
  0x8c   :  { %55 = dma.vmem_to_hbm [thread:$0]  %s53_s22, 128, %s191_s3, [#allocation3]  }
  0x8d   :  { %s101_s6 = scalar_lea.vmem %s63_s23, 128  ;;  %p106_p9 = scmp.lt.s32.totalorder %s63_s23, %s63_s23 }
  0x8e   :  { %p102_p8 = scmp.ne.s32.totalorder %s63_s23, %s101_s6  ;;  %p107_p10 = scmp.lt.s32.totalorder %s101_s6, %s101_s6 }
  0x90   :  { %p108_p11 = por %p107_p10, %p106_p9 }
  0x92   :  { %p109_p12 = pnand %p108_p11, %p102_p8 }
  0x94   :  { %112 = shalt.err (!%p109_p12)
}
  0x95   :  { %s113_s9 = scalar_lea.hbm %s192_s4, 128 }
  0x96   :  { %p114_p13 = scmp.ne.s32.totalorder %s192_s4, %s113_s9  ;;  %p117_p0 = scmp.lt.u32.totalorder %s113_s9, %s192_s4 }
  0x98   :  { %p119_p1 = pnand %p117_p0, %p114_p13 }
  0x9a   :  { %122 = shalt.err (!%p119_p1)
}
  0x9b   :  { %65 = dma.vmem_to_hbm [thread:$0]  %s63_s23, 128, %s192_s4, [#allocation5]  }
  0x9c   :  { %123 = dma.done.wait [#allocation3], 128  }
  0x9d   :  { %124 = vsyncadd [#allocation3], 4294967168 }
  0x9e   :  { %125 = dma.done.wait [#allocation5], 128  }
  0x9f   :  { %126 = vsyncadd [#allocation5], 4294967168 }
  0xa0   :  { %72 = vsyncpa [#allocation3], 1 }
  0xa1   :  { %73 = vsyncpa [#allocation5], 1 }

</bundles_post_ra>
